<compile_context>
chip_gen: v7x
topology: tpu7x:2x2x1
jax: 0.10.0
libtpu: 0.0.40
codegen_flags: <defaults>
</compile_context>

<pallas_src>
import functools

import jax
import jax.numpy as jnp
from jax.experimental import pallas as pl
from jax.experimental.pallas import tpu as pltpu


def _round_up(x: int, m: int) -> int:
    return ((x + m - 1) // m) * m


def _pick_tile(padded_dim: int, max_tile: int, align: int) -> int:
    """Largest multiple of `align` that divides `padded_dim` and is <= max_tile."""
    t = min(max_tile, padded_dim)
    t = max((t // align) * align, align)
    while padded_dim % t:
        t -= align
    return t


# ----------------------------------------------------------------------------
# Parameter setup (done ONCE, not per forward call): fold the two Linear
# branches for the additive join, pad to lane-dense shapes, cast to MXU dtype.
# ----------------------------------------------------------------------------
def fold_parrallel_params(w1, b1, w2, b2, *, mxu_dtype=jnp.bfloat16):
    """w*: (D_out, D_in) PyTorch layout; b*: (D_out,).

    Returns (w_p, b_p, d_out):
      w_p : (Kp, Np) padded, transposed, summed weights (mxu_dtype or f32)
      b_p : (1, Np)  padded, summed bias (f32; bias add stays in f32)
      d_out: original output feature count (for slicing the result back)
    Exact for join_module = add with a shared input.
    """
    d_out, d_in = w1.shape
    kp = _round_up(d_in, 128)     # lane dim of x / sublane dim of W
    np_ = _round_up(d_out, 128)   # lane dim of W and the output

    w_sum_t = jnp.transpose((w1 + w2).astype(jnp.float32))      # (D_in, D_out)
    b_sum = (b1 + b2).astype(jnp.float32).reshape(1, -1)         # (1, D_out)

    w_p = jnp.pad(w_sum_t, ((0, kp - d_in), (0, np_ - d_out)))
    b_p = jnp.pad(b_sum, ((0, 0), (0, np_ - d_out)))
    if mxu_dtype is not None:
        w_p = w_p.astype(mxu_dtype)
    return w_p, b_p, d_out


# ----------------------------------------------------------------------------
# Kernels
# ----------------------------------------------------------------------------
def _matmul_bias_kernel(x_ref, w_ref, b_ref, o_ref, acc_ref):
    """Tiled y = x @ W + b with an f32 VMEM accumulator over the K grid axis."""
    k = pl.program_id(2)

    @pl.when(k == 0)
    def _init():
        acc_ref[...] = jnp.zeros_like(acc_ref)

    acc_ref[...] += jnp.dot(
        x_ref[...], w_ref[...], preferred_element_type=jnp.float32
    )

    @pl.when(k == pl.num_programs(2) - 1)
    def _finalize():
        o_ref[...] = (acc_ref[...] + b_ref[...].astype(jnp.float32)).astype(
            o_ref.dtype
        )


def _matmul_bias_single_block_kernel(x_ref, w_ref, b_ref, o_ref):
    """Fast path: whole problem fits in one block -> no accumulator / pl.when."""
    o_ref[...] = (
        jnp.dot(x_ref[...], w_ref[...], preferred_element_type=jnp.float32)
        + b_ref[...].astype(jnp.float32)
    ).astype(o_ref.dtype)


# ----------------------------------------------------------------------------
# Forward wrapper
# ----------------------------------------------------------------------------
@functools.partial(
    jax.jit,
    static_argnames=("d_out", "max_tm", "max_tn", "max_tk", "mxu_dtype"),
)
def parrallel_forward(x, w_p, b_p, d_out, *, max_tm=256, max_tn=512, max_tk=512,
                      mxu_dtype=jnp.bfloat16):
    """x: (B, D_in); w_p: (Kp, Np) pre-padded folded weights; b_p: (1, Np)."""
    B, D_in = x.shape
    Kp, Np = w_p.shape
    out_dtype = x.dtype

    in_dtype = mxu_dtype if mxu_dtype is not None else x.dtype
    in_item = jnp.dtype(in_dtype).itemsize
    out_item = jnp.dtype(out_dtype).itemsize
    # Native sublane packing: f32 -> 8, bf16/f16 -> 16, int8/fp8 -> 32.
    b_align = {4: 8, 2: 16, 1: 32}[in_item]

    Bp = _round_up(B, b_align)

    # Per-call x handling only: cast to MXU dtype, pad only if actually needed.
    x_c = x.astype(in_dtype)
    if Bp != B or Kp != D_in:
        x_c = jnp.pad(x_c, ((0, Bp - B), (0, Kp - D_in)))

    # Tile sizes: divisors of the (lane-aligned) padded dims.
    tm = _pick_tile(Bp, max_tm, b_align)
    tk = _pick_tile(Kp, max_tk, 128)
    tn = _pick_tile(Np, max_tn, 128)

    # v7x has 2 TensorCores: guarantee >= 2 parallel grid points when possible,
    # otherwise one core idles on small-batch problems.
    if Bp // tm == 1 and Np // tn == 1 and Np % 256 == 0:
        tn = Np // 2

    grid = (Bp // tm, Np // tn, Kp // tk)

    if grid == (1, 1, 1):
        # Single-block fast path (the actual B=8, D=32 instantiation lands here).
        out_p = pl.pallas_call(
            _matmul_bias_single_block_kernel,
            out_shape=jax.ShapeDtypeStruct((Bp, Np), out_dtype),
            grid=(1,),
            in_specs=[
                pl.BlockSpec((Bp, Kp), lambda i: (0, 0)),
                pl.BlockSpec((Kp, Np), lambda i: (0, 0)),
                pl.BlockSpec((1, Np), lambda i: (0, 0)),
            ],
            out_specs=pl.BlockSpec((Bp, Np), lambda i: (0, 0)),
        )(x_c, w_p, b_p)
    else:
        # Static VMEM budget: double-buffered x/W/out + f32 accumulator + bias.
        vmem_bytes = (
            2 * tm * tk * in_item
            + 2 * tk * tn * in_item
            + 2 * tm * tn * out_item
            + tm * tn * 4
            + 2 * tn * 4
        )
        vmem_limit = None
        if vmem_bytes > (28 << 20):
            # Stay within v7x's 64 MiB physical VMEM (48 MiB cap leaves headroom).
            vmem_limit = min(vmem_bytes + (4 << 20), 48 << 20)

        grid_spec = pltpu.PrefetchScalarGridSpec(
            num_scalar_prefetch=0,
            grid=grid,
            in_specs=[
                pl.BlockSpec((tm, tk), lambda i, j, k: (i, k)),   # x tile
                pl.BlockSpec((tk, tn), lambda i, j, k: (k, j)),   # W tile
                pl.BlockSpec((1, tn), lambda i, j, k: (0, j)),    # bias tile
            ],
            out_specs=pl.BlockSpec((tm, tn), lambda i, j, k: (i, j)),
            scratch_shapes=[pltpu.VMEM((tm, tn), jnp.float32)],
        )

        out_p = pl.pallas_call(
            _matmul_bias_kernel,
            out_shape=jax.ShapeDtypeStruct((Bp, Np), out_dtype),
            grid_spec=grid_spec,
            compiler_params=pltpu.CompilerParams(
                dimension_semantics=("parallel", "parallel", "arbitrary"),
                vmem_limit_bytes=vmem_limit,
            ),
        )(x_c, w_p, b_p)

    if Bp == B and Np == d_out:
        return out_p
    return out_p[:B, :d_out]


if __name__ == "__main__":
    key = jax.random.PRNGKey(0)

    # --- Test 1: small shapes consistent with the module (single-block path) ---
    B, D_in, D_out = 8, 32, 32
    k_x, k_w1, k_b1, k_w2, k_b2, key = jax.random.split(key, 6)
    x = jax.random.normal(k_x, (B, D_in), dtype=jnp.float32)
    w1 = jax.random.normal(k_w1, (D_out, D_in), dtype=jnp.float32) * 0.1
    b1 = jax.random.normal(k_b1, (D_out,), dtype=jnp.float32) * 0.1
    w2 = jax.random.normal(k_w2, (D_out, D_in), dtype=jnp.float32) * 0.1
    b2 = jax.random.normal(k_b2, (D_out,), dtype=jnp.float32) * 0.1

    w_p, b_p, d_out = fold_parrallel_params(w1, b1, w2, b2)  # once, not per call
    out = jax.block_until_ready(parrallel_forward(x, w_p, b_p, d_out))

    ref = (x @ w1.T + b1) + (x @ w2.T + b2)
    assert out.shape == (B, D_out)
    # bf16 MXU operands (f32 accumulation): loosened tolerance vs f32 reference.
    assert jnp.allclose(out, ref, atol=5e-2, rtol=5e-2)

    # --- Test 2: larger shapes exercising the tiled/accumulating path ---
    B2, D_in2, D_out2 = 48, 1024, 512
    k_x, k_w1, k_b1, k_w2, k_b2, key = jax.random.split(key, 6)
    x2 = jax.random.normal(k_x, (B2, D_in2), dtype=jnp.float32)
    w1_2 = jax.random.normal(k_w1, (D_out2, D_in2), dtype=jnp.float32) * 0.05
    b1_2 = jax.random.normal(k_b1, (D_out2,), dtype=jnp.float32) * 0.05
    w2_2 = jax.random.normal(k_w2, (D_out2, D_in2), dtype=jnp.float32) * 0.05
    b2_2 = jax.random.normal(k_b2, (D_out2,), dtype=jnp.float32) * 0.05

    w_p2, b_p2, d_out2 = fold_parrallel_params(w1_2, b1_2, w2_2, b2_2)
    out2 = jax.block_until_ready(parrallel_forward(x2, w_p2, b_p2, d_out2))

    ref2 = (x2 @ w1_2.T + b1_2) + (x2 @ w2_2.T + b2_2)
    assert out2.shape == (B2, D_out2)
    assert jnp.allclose(out2, ref2, atol=2e-1, rtol=5e-2)

    # TODO(synk): non-additive join_module callables and arbitrary branch
    # modules are container-level Python dispatch with no single Pallas
    # equivalent; only the two-Linear + additive-join instantiation is
    # kernelized (the additive fold is exact for that case).

    print("KERNEL_OK")
</pallas_src>

<mosaic_0001>
module attributes {stable_mosaic.version = 11 : i64} {
  func.func @_matmul_bias_single_block_kernel(%arg0: i32, %arg1: memref<16x128xbf16, #tpu.memory_space<vmem>>, %arg2: memref<128x128xbf16, #tpu.memory_space<vmem>>, %arg3: memref<1x128xf32, #tpu.memory_space<vmem>>, %arg4: memref<16x128xf32, #tpu.memory_space<vmem>>) attributes {dimension_semantics = [#tpu.dimension_semantics<arbitrary>], iteration_bounds = array<i64: 1>, scalar_prefetch = 0 : i64, scratch_operands = 0 : i64, tpu.core_type = #tpu.core_type<tc>, window_params = [{pipeline_mode = #tpu.pipeline_mode<synchronous>, transform_indices = @transform_0, window_bounds = array<i64: 16, 128>}, {pipeline_mode = #tpu.pipeline_mode<synchronous>, transform_indices = @transform_1, window_bounds = array<i64: 128, 128>}, {pipeline_mode = #tpu.pipeline_mode<synchronous>, transform_indices = @transform_2, window_bounds = array<i64: 1, 128>}, {pipeline_mode = #tpu.pipeline_mode<synchronous>, transform_indices = @transform_3, window_bounds = array<i64: 16, 128>}]} {
    %c0 = arith.constant 0 : index
    %c0_0 = arith.constant 0 : index
    %0 = vector.load %arg1[%c0, %c0_0] : memref<16x128xbf16, #tpu.memory_space<vmem>>, vector<16x128xbf16>
    %c0_1 = arith.constant 0 : index
    %c0_2 = arith.constant 0 : index
    %1 = vector.load %arg2[%c0_1, %c0_2] : memref<128x128xbf16, #tpu.memory_space<vmem>>, vector<128x128xbf16>
    %cst = arith.constant dense<0.000000e+00> : vector<16x128xf32>
    %2 = tpu.matmul %0, %1, %cst {dimension_numbers = #tpu.dot_dimension_numbers<[1], [0], [0], [1], [0, 0, 1, 1], [], []>} : vector<16x128xbf16>, vector<128x128xbf16>, vector<16x128xf32> -> vector<16x128xf32>
    %c0_3 = arith.constant 0 : index
    %c0_4 = arith.constant 0 : index
    %3 = vector.load %arg3[%c0_3, %c0_4] : memref<1x128xf32, #tpu.memory_space<vmem>>, vector<1x128xf32>
    %4 = vector.broadcast %3 : vector<1x128xf32> to vector<16x128xf32>
    %5 = arith.addf %2, %4 : vector<16x128xf32>
    %c0_5 = arith.constant 0 : index
    %c0_6 = arith.constant 0 : index
    %6 = vector.load %arg4[%c0_5, %c0_6] : memref<16x128xf32, #tpu.memory_space<vmem>>, vector<16x128xf32>
    tpu.vector_store %arg4[%c0_5, %c0_6], %5 {strides = array<i32>} : memref<16x128xf32, #tpu.memory_space<vmem>>, vector<16x128xf32>,
    return
  }
  func.func @transform_0(%arg0: i32) -> (i32, i32) {
    %c0_i32 = arith.constant 0 : i32
    %c0_i32_0 = arith.constant 0 : i32
    %c0_i32_1 = arith.constant 0 : i32
    return %c0_i32, %c0_i32_0 : i32, i32
  }
  func.func @transform_1(%arg0: i32) -> (i32, i32) {
    %c0_i32 = arith.constant 0 : i32
    %c0_i32_0 = arith.constant 0 : i32
    %c0_i32_1 = arith.constant 0 : i32
    return %c0_i32, %c0_i32_0 : i32, i32
  }
  func.func @transform_2(%arg0: i32) -> (i32, i32) {
    %c0_i32 = arith.constant 0 : i32
    %c0_i32_0 = arith.constant 0 : i32
    %c0_i32_1 = arith.constant 0 : i32
    return %c0_i32, %c0_i32_0 : i32, i32
  }
  func.func @transform_3(%arg0: i32) -> (i32, i32) {
    %c0_i32 = arith.constant 0 : i32
    %c0_i32_0 = arith.constant 0 : i32
    %c0_i32_1 = arith.constant 0 : i32
    return %c0_i32, %c0_i32_0 : i32, i32
  }
}

</mosaic_0001>

<bundles_post_ra>
// kernel: parrallel_forward.1
= control target key start
LH: loop header
LB: loop body
LE: loop exit
PB: predicated region body
PF: predicated region fallthrough
CT: control target
= control target key end

     0   :  { %8 = vsyncpa [#allocation3], 0  ;;  %s233_s12 = smov [#allocation2]   ;;  %s282_s0 = inlined_call_operand.vmem [shape: bf16[16,128], index: 0, kind: input, shape index: {}]   ;;  %s283_s1 = inlined_call_operand.hbm [shape: bf16[128,128], index: 1, kind: input, shape index: {}]   ;;  %s284_s2 = inlined_call_operand.vmem [shape: f32[1,128], index: 2, kind: input, shape index: {}]   ;;  %s285_s3 = inlined_call_operand.vmem [shape: f32[16,128], index: 3, kind: output, shape index: {}]  }
   0x1   :  { %s16_s13 = sshll.u32 %s233_s12, 4  ;;  %s209_s16 = scalar_lea.hbm %s283_s1, 1024  ;;  %s17_s13 = int_to_ptr.vmem [resolvable:$true] %s16_s13 }
   0x2   :  { %p210_p0 = scmp.ne.s32.totalorder %s283_s1, %s209_s16  ;;  %p213_p1 = scmp.lt.u32.totalorder %s209_s16, %s283_s1 }
   0x4   :  { %p215_p2 = pnand %p213_p1, %p210_p0 }
   0x6   :  { %218 = shalt.err (!%p215_p2)
}
   0x7   :  { %s219_s21 = scalar_lea.vmem %s17_s13, 1024  ;;  %p224_p4 = scmp.lt.s32.totalorder %s17_s13, %s17_s13 }
   0x8   :  { %p220_p3 = scmp.ne.s32.totalorder %s17_s13, %s219_s21  ;;  %p225_p5 = scmp.lt.s32.totalorder %s219_s21, %s219_s21 }
   0xa   :  { %p226_p6 = por %p225_p5, %p224_p4 }
   0xc   :  { %p227_p7 = pnand %p226_p6, %p220_p3 }
   0xe   :  { %230 = shalt.err (!%p227_p7)
}
   0xf   :  { %s234_s22 = smov 64   ;;  %s235_s23 = smov 4  }
  0x10   :  { %22 = dma.hbm_to_vmem [thread:$0]  %s283_s1, 1024, %s17_s13, [#allocation3], %s234_s22, %s234_s22, %s235_s23  }
  0x11   :  { %231 = dma.done.wait [#allocation3], 1024  }
  0x12   :  { %232 = vsyncadd [#allocation3], 4294966272  ;;  %v236_v0 = vmov 0.0   ;;  %vm237_vm0 = vmmov 0   ;;  %v200_v1 = vld [vmem:[#allocation2] sm:$0xff]   ;;  %v201_v2 = vld [vmem:[#allocation2 + $0x8] sm:$0xff]  }
  0x13   :  { %175 = vmatprep.subr.bf16.mxu0 %v236_v0  ;;  %191 = vmatprep.mubr.msk.bf16.mxu0 %vm237_vm0, %v236_v0  ;;  %v202_v3 = vld [vmem:[#allocation2 + $0x10] sm:$0xff]   ;;  %v203_v4 = vld [vmem:[#allocation2 + $0x18] sm:$0xff]   ;;  %v204_v5 = vld [vmem:[#allocation2 + $0x20] sm:$0xff]  }
  0x14   :  { %176 = vmatpush3.bf16.msra.mxu0 %v200_v1  ;;  %v205_v6 = vld [vmem:[#allocation2 + $0x28] sm:$0xff]   ;;  %v206_v7 = vld [vmem:[#allocation2 + $0x30] sm:$0xff]   ;;  %v207_v8 = vld [vmem:[#allocation2 + $0x38] sm:$0xff]  }
  0x15   :  { %177 = vmatprep.subr.bf16.mxu0 %v236_v0  ;;  %v208_v9 = vld [vmem:[%s282_s0] sm:$0xff]  }
  0x16   :  { %v156_v10 = vld [vmem:[%s284_s2] ss:$0 sm:$0xff] }
  0x18   :  { %178 = vmatpush3.bf16.msra.mxu0 %v201_v2 }
  0x19   :  { %179 = vmatprep.subr.bf16.mxu0 %v236_v0 }
  0x1c   :  { %180 = vmatpush3.bf16.msra.mxu0 %v202_v3 }
  0x1d   :  { %181 = vmatprep.subr.bf16.mxu0 %v236_v0 }
  0x20   :  { %182 = vmatpush3.bf16.msra.mxu0 %v203_v4 }
  0x21   :  { %183 = vmatprep.subr.bf16.mxu0 %v236_v0 }
  0x24   :  { %184 = vmatpush3.bf16.msra.mxu0 %v204_v5 }
  0x25   :  { %185 = vmatprep.subr.bf16.mxu0 %v236_v0 }
  0x28   :  { %186 = vmatpush3.bf16.msra.mxu0 %v205_v6 }
  0x29   :  { %187 = vmatprep.subr.bf16.mxu0 %v236_v0 }
  0x2c   :  { %188 = vmatpush3.bf16.msra.mxu0 %v206_v7 }
  0x2d   :  { %189 = vmatprep.subr.bf16.mxu0 %v236_v0 }
  0x30   :  { %190 = vmatpush3.bf16.msra.mxu0 %v207_v8 }
  0x33   :  { %192 = vmatmul.mubr.bf16.vlgmr.msra.gmra.mrb[0].mxu0 %v208_v9 }
 0x106   :  { %v142_v11 = vpop.f32.mrb[0].mxu0 }
 0x107   :  { %v143_v12 = vadd.f32 %v156_v10, %v142_v11  ;;  %v193_v13 = vpop.f32.mrb[1].mxu0 }
 0x108   :  { %v145_v14 = vpop.f32.mrb[2].mxu0 }
 0x109   :  { %149 = vst [vmem:[%s285_s3] sm:$0xff] %v143_v12  ;;  %v146_v15 = vadd.f32 %v156_v10, %v145_v14  ;;  %v194_v16 = vpop.f32.mrb[3].mxu0 }
 0x10b   :  { %150 = vst [vmem:[%s285_s3 + $0x8] sm:$0xff] %v146_v15 }
 0x10c   :  { %155 = vsyncpa [#allocation3], 1 }

</bundles_post_ra>
